<compile_context>
chip_gen: v7x
topology: tpu7x:2x2x1
jax: 0.10.0
libtpu: 0.0.40
codegen_flags: <defaults>
</compile_context>

<pallas_src>
import functools

import numpy as np
import jax
import jax.numpy as jnp
from jax import lax
from jax.experimental import pallas as pl
from jax.experimental.pallas import tpu as pltpu

try:  # fast C Hungarian if available (matches the reference's scipy call)
    from scipy.optimize import linear_sum_assignment as _scipy_lsa
except Exception:  # pragma: no cover
    _scipy_lsa = None


_VMEM_LIMIT = 32 * 1024 * 1024  # explicit scoped-VMEM budget, valid on v5e/v6e/v7x


def _pick_tile(n: int) -> int:
    """Largest MXU-friendly row tile dividing n that keeps per-step VMEM flat.

    The column dim stays un-tiled (= n) in these kernels, so bound the row tile
    by a conservative estimate of ~6 live (tile, n) f32 slabs (inputs/outputs
    incl. double-buffering) against the scoped budget.  256/512 multiples feed
    the v6e/v7x 256x256 MXUs; they are also 128-multiples, so v5e is fine.
    """
    budget = 24 * 1024 * 1024
    for t in (512, 256, 128):
        if n % t == 0 and n >= t and 6 * t * n * 4 <= budget:
            return t
    return n  # small / odd n: single full-array block (always legal)


# --------------------------------------------------------------------------- #
# Fused Pallas kernel: link probabilities + matching-cost matrix
#
# TODO(synk): the real `propagator.latent_attention.kernel` implementation is
# not part of the provided module; a truncated Gaussian (RBF) kernel on the
# latent signatures with static bandwidth / truncation ("do_not_sample" path)
# is the deterministic stand-in producing the (N, N) link-probability matrix.
#
# Grid (r, t):
#   t == 0 : compute link-prob rows LP[r-block, :] against ALL latents and
#            write them to the (resident-over-t) lp output block.
#   every t: cost[t-block, r-block] = mean_c (G[t,c] - LP[r,c])^2, expanded as
#            row norms + MXU cross term (no transposes anywhere).
# --------------------------------------------------------------------------- #
def _linkprob_cost_kernel(sig_r_ref, sig_all_ref, sig_sq_ref, g_ref,
                          lp_ref, cost_ref,
                          *, neg_inv_two_bw2, truncation, inv_n):
    t = pl.program_id(1)

    @pl.when(t == 0)
    def _():
        s_r = sig_r_ref[...].astype(jnp.float32)                    # (TR, D)
        s_all = sig_all_ref[...].astype(jnp.float32)                # (N, D)
        sq_r = jnp.sum(s_r * s_r, axis=-1, keepdims=True)           # (TR, 1)
        gram = lax.dot_general(                                     # (TR, N) MXU,
            s_r, s_all, (((1,), (1,)), ((), ())),                   # contract last
            preferred_element_type=jnp.float32)                     # dims (no .T)
        d2 = jnp.maximum(sq_r + sig_sq_ref[...] - 2.0 * gram, 0.0)  # ||si - sj||^2
        k = jnp.exp(d2 * neg_inv_two_bw2)                           # EUP slot
        lp_ref[...] = jnp.where(k >= truncation, k, jnp.zeros_like(k))

    lp = lp_ref[...]                                                # (TR, N) resident
    g = g_ref[...]                                                  # (TT, N)
    g_sq = jnp.sum(g * g, axis=-1, keepdims=True)                   # (TT, 1)
    ones_row = jnp.ones((1, lp.shape[1]), jnp.float32)
    lp_sq = lax.dot_general(ones_row, lp * lp,                      # (1, TR) directly
                            (((1,), (1,)), ((), ())),               # in row layout
                            preferred_element_type=jnp.float32)
    cross = lax.dot_general(g, lp, (((1,), (1,)), ((), ())),        # (TT, TR) MXU
                            preferred_element_type=jnp.float32)
    cost_ref[...] = (g_sq + lp_sq - 2.0 * cross) * inv_n


def link_probabilities_and_cost(signatures, graphon, *, bandwidth, truncation):
    signatures = signatures.astype(jnp.float32)
    graphon = graphon.astype(jnp.float32)
    n, d = signatures.shape
    tile = _pick_tile(n)
    # Cheap row-norm pre-pass emitted in (1, N) row layout so the in-kernel
    # epilogue stays pure VPU (no per-tile (N,1) -> (1,N) cross-lane transpose).
    sig_sq = jnp.sum(signatures * signatures, axis=-1)[None, :]

    kernel = functools.partial(
        _linkprob_cost_kernel,
        neg_inv_two_bw2=-1.0 / (2.0 * float(bandwidth) ** 2),
        truncation=float(truncation),
        inv_n=1.0 / float(n))

    lp, cost = pl.pallas_call(
        kernel,
        grid=(n // tile, n // tile),                                  # (r, t)
        in_specs=[
            pl.BlockSpec((tile, d), lambda r, t: (r, 0)),   # signature rows (r-block)
            pl.BlockSpec((n, d),    lambda r, t: (0, 0)),   # all signatures (resident)
            pl.BlockSpec((1, n),    lambda r, t: (0, 0)),   # precomputed row norms
            pl.BlockSpec((tile, n), lambda r, t: (t, 0)),   # graphon rows (t-block)
        ],
        out_specs=(
            pl.BlockSpec((tile, n),    lambda r, t: (r, 0)),  # link probs (resident over t)
            pl.BlockSpec((tile, tile), lambda r, t: (t, r)),  # cost block
        ),
        out_shape=(
            jax.ShapeDtypeStruct((n, n), jnp.float32),
            jax.ShapeDtypeStruct((n, n), jnp.float32),
        ),
        compiler_params=pltpu.CompilerParams(
            dimension_semantics=("parallel", "arbitrary"),
            vmem_limit_bytes=_VMEM_LIMIT),
    )(signatures, signatures, sig_sq, graphon)
    return lp, cost


# --------------------------------------------------------------------------- #
# Pallas kernel: matched (optionally lower-clipped) MSE loss, tiled over rows.
#
# The Hungarian permutation is folded in:  mse(LP[p], G) == mse(LP, G[p^-1]),
# and G's rows are fully determined by their cluster, so each LP row k only
# needs the cluster id of the graphon row it was matched to.  The matched
# graphon rows are synthesized in-kernel from that id with the exact
# p_in / p_out block structure of get_sampled_graphon (no (N,N) gather copy).
# --------------------------------------------------------------------------- #
def _matched_loss_kernel(lp_ref, cid_ref, out_ref,
                         *, p_in, p_out, cluster_size, clip, inv_total):
    i = pl.program_id(0)

    @pl.when(i == 0)
    def _():
        out_ref[...] = jnp.zeros_like(out_ref)

    lp = lp_ref[...]                                                  # (TI, N)
    col_cluster = lax.broadcasted_iota(jnp.int32, lp.shape, 1) // cluster_size
    g = jnp.where(cid_ref[...] == col_cluster,
                  jnp.float32(p_in), jnp.float32(p_out))              # (TI, N)
    diff = lp - g
    l = diff * diff
    if clip is not None and clip != 0.0:
        l = jnp.where(l < clip, jnp.full_like(l, clip), l)            # floor at clip
    out_ref[...] += jnp.sum(l, keepdims=True)                         # (1, 1) acc

    @pl.when(i == pl.num_programs(0) - 1)
    def _():
        out_ref[...] = out_ref[...] * inv_total


def matched_loss(link_probability, matched_cluster_ids, *, p_in, p_out,
                 cluster_size, clip):
    n = link_probability.shape[0]
    tile = _pick_tile(n)
    kernel = functools.partial(
        _matched_loss_kernel, p_in=float(p_in), p_out=float(p_out),
        cluster_size=int(cluster_size), clip=clip,
        inv_total=1.0 / float(n * n))
    out = pl.pallas_call(
        kernel,
        grid=(n // tile,),
        in_specs=[
            pl.BlockSpec((tile, n), lambda i: (i, 0)),
            pl.BlockSpec((tile, 1), lambda i: (i, 0)),
        ],
        out_specs=pl.BlockSpec((1, 1), lambda i: (0, 0)),
        out_shape=jax.ShapeDtypeStruct((1, 1), jnp.float32),
        compiler_params=pltpu.CompilerParams(
            dimension_semantics=("arbitrary",),
            vmem_limit_bytes=_VMEM_LIMIT),
    )(link_probability.astype(jnp.float32), matched_cluster_ids)
    return out[0, 0]


# --------------------------------------------------------------------------- #
# Host-side Hungarian assignment.  The PyTorch reference also runs this on the
# host (.detach().cpu().numpy() + scipy); there is no Pallas equivalent.
# --------------------------------------------------------------------------- #
def _hungarian_fallback(cost):
    """Vectorized numpy shortest-augmenting-path (minimize)."""
    n = cost.shape[0]
    INF = 1e18
    u = np.zeros(n + 1)
    v = np.zeros(n + 1)
    p = np.zeros(n + 1, dtype=np.int64)
    way = np.zeros(n + 1, dtype=np.int64)
    for i in range(1, n + 1):
        p[0] = i
        j0 = 0
        minv = np.full(n + 1, INF)
        used = np.zeros(n + 1, dtype=bool)
        while True:
            used[j0] = True
            i0 = p[j0]
            free = ~used[1:]
            cur = cost[i0 - 1, :] - u[i0] - v[1:]
            upd = free & (cur < minv[1:])
            minv[1:][upd] = cur[upd]
            way[1:][upd] = j0
            masked = np.where(free, minv[1:], INF)
            j1 = int(np.argmin(masked)) + 1
            delta = masked[j1 - 1]
            u[p[used]] += delta
            v[used] -= delta
            minv[1:][free] -= delta
            j0 = j1
            if p[j0] == 0:
                break
        while True:
            j1 = way[j0]
            p[j0] = p[j1]
            j0 = j1
            if j0 == 0:
                break
    col_of_row = np.zeros(n, dtype=np.int64)
    for j in range(1, n + 1):
        if p[j] > 0:
            col_of_row[p[j] - 1] = j - 1
    return col_of_row


def _hungarian_col_for_row(cost):
    cost = np.asarray(cost, dtype=np.float64)
    if _scipy_lsa is not None:
        _, col = _scipy_lsa(cost)
        return np.asarray(col, dtype=np.int64)
    return _hungarian_fallback(cost)


# --------------------------------------------------------------------------- #
# JAX/Pallas port of StochasticBlockModelRegularization (single latent graph,
# kernel_is_unique == True path -> one link-probability matrix).
# --------------------------------------------------------------------------- #
class StochasticBlockModelRegularization:
    def __init__(self, signatures, num_clusters=4, p_in=0.9, p_out=0.05,
                 bandwidth=8.0, truncation=1e-3, clip=None):
        self.signatures = jnp.asarray(signatures, dtype=jnp.float32)
        self.num_clusters = num_clusters
        self.p_in = float(p_in)
        self.p_out = float(p_out)
        self.bandwidth = float(bandwidth)
        self.truncation = float(truncation)
        self.clip = clip
        assert self.num_regularized_latents % num_clusters == 0
        self.sampled_graphon = self.get_sampled_graphon()

    @property
    def num_regularized_latents(self):
        return self.signatures.shape[0]

    @property
    def cluster_size(self):
        return self.num_regularized_latents // self.num_clusters

    def get_sampled_graphon(self):
        n = self.num_regularized_latents
        clusters = np.arange(n) // self.cluster_size
        g = np.where(clusters[:, None] == clusters[None, :], self.p_in, self.p_out)
        return jnp.asarray(g, dtype=jnp.float32)

    def _matched_cluster_ids(self, cost):
        # Hungarian on host, no gradient path (matches torch.no_grad() + scipy).
        # input_idx[i] = adjacency row matched to graphon row i; its inverse
        # gives, per adjacency row, the cluster of the graphon row it faces.
        input_idx = _hungarian_col_for_row(np.asarray(jax.device_get(cost)))
        inverse_idx = np.argsort(input_idx)
        cids = (inverse_idx // self.cluster_size).astype(np.int32).reshape(-1, 1)
        return jnp.asarray(cids)

    def forward(self):
        losses = []
        # kernel_is_unique == True path: a single shared kernel over all latents.
        for _ in range(1):
            lp, cost = link_probabilities_and_cost(
                self.signatures, self.sampled_graphon,
                bandwidth=self.bandwidth, truncation=self.truncation)
            cids = self._matched_cluster_ids(cost)
            losses.append(matched_loss(
                lp, cids, p_in=self.p_in, p_out=self.p_out,
                cluster_size=self.cluster_size, clip=self.clip))
        return jnp.stack(losses).sum()


if __name__ == "__main__":
    key = jax.random.PRNGKey(0)

    # Lane-dense small shapes: 128 regularized latents (4 clusters of 32),
    # 128-d signatures (deterministic synthetic "model parameters").
    num_latents, sig_dim = 128, 128
    signatures = jax.random.normal(key, (num_latents, sig_dim), dtype=jnp.float32)

    reg = StochasticBlockModelRegularization(
        signatures,
        num_clusters=4,
        p_in=0.9,
        p_out=0.05,
        bandwidth=8.0,
        truncation=1e-3,
        clip=None,
    )
    loss = reg.forward()
    jax.block_until_ready(loss)
    assert loss.shape == () and jnp.isfinite(loss)
    print("KERNEL_OK")
</pallas_src>

<mosaic_0001>
module attributes {stable_mosaic.version = 11 : i64} {
  func.func @_linkprob_cost_kernel(%arg0: i32, %arg1: i32, %arg2: memref<128x128xf32, #tpu.memory_space<vmem>>, %arg3: memref<128x128xf32, #tpu.memory_space<vmem>>, %arg4: memref<1x128xf32, #tpu.memory_space<vmem>>, %arg5: memref<128x128xf32, #tpu.memory_space<vmem>>, %arg6: memref<128x128xf32, #tpu.memory_space<vmem>>, %arg7: memref<128x128xf32, #tpu.memory_space<vmem>>) attributes {dimension_semantics = [#tpu.dimension_semantics<parallel>, #tpu.dimension_semantics<arbitrary>], iteration_bounds = array<i64: 1, 1>, scalar_prefetch = 0 : i64, scratch_operands = 0 : i64, tpu.core_type = #tpu.core_type<tc>, window_params = [{transform_indices = @transform_0, window_bounds = array<i64: 128, 128>}, {pipeline_mode = #tpu.pipeline_mode<synchronous>, transform_indices = @transform_1, window_bounds = array<i64: 128, 128>}, {pipeline_mode = #tpu.pipeline_mode<synchronous>, transform_indices = @transform_2, window_bounds = array<i64: 1, 128>}, {transform_indices = @transform_3, window_bounds = array<i64: 128, 128>}, {transform_indices = @transform_4, window_bounds = array<i64: 128, 128>}, {transform_indices = @transform_5, window_bounds = array<i64: 128, 128>}]} {
    %c0_i32 = arith.constant 0 : i32
    %0 = arith.cmpi eq, %arg1, %c0_i32 : i32
    %1 = arith.extui %0 : i1 to i32
    %c0_i32_0 = arith.constant 0 : i32
    %2 = arith.cmpi ne, %1, %c0_i32_0 : i32
    scf.if %2 {
      %c0_11 = arith.constant 0 : index
      %c0_12 = arith.constant 0 : index
      %21 = vector.load %arg2[%c0_11, %c0_12] : memref<128x128xf32, #tpu.memory_space<vmem>>, vector<128x128xf32>
      %c0_13 = arith.constant 0 : index
      %c0_14 = arith.constant 0 : index
      %22 = vector.load %arg3[%c0_13, %c0_14] : memref<128x128xf32, #tpu.memory_space<vmem>>, vector<128x128xf32>
      %23 = arith.mulf %21, %21 : vector<128x128xf32>
      %cst_15 = arith.constant dense<0.000000e+00> : vector<128xf32>
      %24 = vector.multi_reduction <add>, %23, %cst_15 [1] : vector<128x128xf32> to vector<128xf32>
      %25 = vector.shape_cast %24 : vector<128xf32> to vector<128x1xf32>
      %cst_16 = arith.constant dense<0.000000e+00> : vector<128x128xf32>
      %26 = tpu.matmul %21, %22, %cst_16 {dimension_numbers = #tpu.dot_dimension_numbers<[1], [1], [0], [0], [0, 0, 1, 0], [], []>} : vector<128x128xf32>, vector<128x128xf32>, vector<128x128xf32> -> vector<128x128xf32>
      %c0_17 = arith.constant 0 : index
      %c0_18 = arith.constant 0 : index
      %27 = vector.load %arg4[%c0_17, %c0_18] : memref<1x128xf32, #tpu.memory_space<vmem>>, vector<1x128xf32>
      %28 = vector.broadcast %25 : vector<128x1xf32> to vector<128x128xf32>
      %29 = vector.broadcast %27 : vector<1x128xf32> to vector<128x128xf32>
      %30 = arith.addf %28, %29 : vector<128x128xf32>
      %cst_19 = arith.constant 2.000000e+00 : f32
      %31 = vector.broadcast %cst_19 : f32 to vector<128x128xf32>
      %32 = arith.mulf %31, %26 : vector<128x128xf32>
      %33 = arith.subf %30, %32 : vector<128x128xf32>
      %cst_20 = arith.constant 0.000000e+00 : f32
      %34 = vector.broadcast %cst_20 : f32 to vector<128x128xf32>
      %35 = arith.maximumf %33, %34 : vector<128x128xf32>
      %cst_21 = arith.constant -7.812500e-03 : f32
      %36 = vector.broadcast %cst_21 : f32 to vector<128x128xf32>
      %37 = arith.mulf %35, %36 : vector<128x128xf32>
      %38 = math.exp %37 : vector<128x128xf32>
      %cst_22 = arith.constant 1.000000e-03 : f32
      %39 = vector.broadcast %cst_22 : f32 to vector<128x128xf32>
      %40 = arith.cmpf oge, %38, %39 : vector<128x128xf32>
      %cst_23 = arith.constant 0.000000e+00 : f32
      %41 = vector.broadcast %cst_23 : f32 to vector<128x128xf32>
      %42 = arith.select %40, %38, %41 : vector<128x128xi1>, vector<128x128xf32>
      %c0_24 = arith.constant 0 : index
      %c0_25 = arith.constant 0 : index
      %43 = vector.load %arg6[%c0_24, %c0_25] : memref<128x128xf32, #tpu.memory_space<vmem>>, vector<128x128xf32>
      tpu.vector_store %arg6[%c0_24, %c0_25], %42 {strides = array<i32>} : memref<128x128xf32, #tpu.memory_space<vmem>>, vector<128x128xf32>,
    } else {
    }
    %c0 = arith.constant 0 : index
    %c0_1 = arith.constant 0 : index
    %3 = vector.load %arg6[%c0, %c0_1] : memref<128x128xf32, #tpu.memory_space<vmem>>, vector<128x128xf32>
    %c0_2 = arith.constant 0 : index
    %c0_3 = arith.constant 0 : index
    %4 = vector.load %arg5[%c0_2, %c0_3] : memref<128x128xf32, #tpu.memory_space<vmem>>, vector<128x128xf32>
    %5 = arith.mulf %4, %4 : vector<128x128xf32>
    %cst = arith.constant dense<0.000000e+00> : vector<128xf32>
    %6 = vector.multi_reduction <add>, %5, %cst [1] : vector<128x128xf32> to vector<128xf32>
    %7 = vector.shape_cast %6 : vector<128xf32> to vector<128x1xf32>
    %cst_4 = arith.constant 1.000000e+00 : f32
    %8 = vector.broadcast %cst_4 : f32 to vector<1x128xf32>
    %9 = arith.mulf %3, %3 : vector<128x128xf32>
    %cst_5 = arith.constant dense<0.000000e+00> : vector<1x128xf32>
    %10 = tpu.matmul %8, %9, %cst_5 {dimension_numbers = #tpu.dot_dimension_numbers<[1], [1], [0], [0], [0, 0, 1, 0], [], []>} : vector<1x128xf32>, vector<128x128xf32>, vector<1x128xf32> -> vector<1x128xf32>
    %cst_6 = arith.constant dense<0.000000e+00> : vector<128x128xf32>
    %11 = tpu.matmul %4, %3, %cst_6 {dimension_numbers = #tpu.dot_dimension_numbers<[1], [1], [0], [0], [0, 0, 1, 0], [], []>} : vector<128x128xf32>, vector<128x128xf32>, vector<128x128xf32> -> vector<128x128xf32>
    %12 = vector.broadcast %7 : vector<128x1xf32> to vector<128x128xf32>
    %13 = vector.broadcast %10 : vector<1x128xf32> to vector<128x128xf32>
    %14 = arith.addf %12, %13 : vector<128x128xf32>
    %cst_7 = arith.constant 2.000000e+00 : f32
    %15 = vector.broadcast %cst_7 : f32 to vector<128x128xf32>
    %16 = arith.mulf %15, %11 : vector<128x128xf32>
    %17 = arith.subf %14, %16 : vector<128x128xf32>
    %cst_8 = arith.constant 7.812500e-03 : f32
    %18 = vector.broadcast %cst_8 : f32 to vector<128x128xf32>
    %19 = arith.mulf %17, %18 : vector<128x128xf32>
    %c0_9 = arith.constant 0 : index
    %c0_10 = arith.constant 0 : index
    %20 = vector.load %arg7[%c0_9, %c0_10] : memref<128x128xf32, #tpu.memory_space<vmem>>, vector<128x128xf32>
    tpu.vector_store %arg7[%c0_9, %c0_10], %19 {strides = array<i32>} : memref<128x128xf32, #tpu.memory_space<vmem>>, vector<128x128xf32>,
    return
  }
  func.func @transform_0(%arg0: i32, %arg1: i32) -> (i32, i32) {
    %c0_i32 = arith.constant 0 : i32
    %c0_i32_0 = arith.constant 0 : i32
    return %arg0, %c0_i32 : i32, i32
  }
  func.func @transform_1(%arg0: i32, %arg1: i32) -> (i32, i32) {
    %c0_i32 = arith.constant 0 : i32
    %c0_i32_0 = arith.constant 0 : i32
    %c0_i32_1 = arith.constant 0 : i32
    return %c0_i32, %c0_i32_0 : i32, i32
  }
  func.func @transform_2(%arg0: i32, %arg1: i32) -> (i32, i32) {
    %c0_i32 = arith.constant 0 : i32
    %c0_i32_0 = arith.constant 0 : i32
    %c0_i32_1 = arith.constant 0 : i32
    return %c0_i32, %c0_i32_0 : i32, i32
  }
  func.func @transform_3(%arg0: i32, %arg1: i32) -> (i32, i32) {
    %c0_i32 = arith.constant 0 : i32
    %c0_i32_0 = arith.constant 0 : i32
    return %arg1, %c0_i32 : i32, i32
  }
  func.func @transform_4(%arg0: i32, %arg1: i32) -> (i32, i32) {
    %c0_i32 = arith.constant 0 : i32
    %c0_i32_0 = arith.constant 0 : i32
    return %arg0, %c0_i32 : i32, i32
  }
  func.func @transform_5(%arg0: i32, %arg1: i32) -> (i32, i32) {
    %c0_i32 = arith.constant 0 : i32
    return %arg1, %arg0 : i32, i32
  }
}

</mosaic_0001>

<bundles_post_ra>
// kernel: tpu_custom_call.1
= control target key start
LH: loop header
LB: loop body
LE: loop exit
PB: predicated region body
PF: predicated region fallthrough
CT: control target
= control target key end

     0   :  { %11 = vsyncpa [#allocation3], 0  ;;  %s1760_s0 = inlined_call_operand.hbm [shape: f32[128,128], index: 0, kind: input, shape index: {}]   ;;  %s1761_s1 = inlined_call_operand.hbm [shape: f32[128,128], index: 1, kind: input, shape index: {}]   ;;  %s1762_s2 = inlined_call_operand.vmem [shape: f32[1,128], index: 2, kind: input, shape index: {}]   ;;  %s1763_s3 = inlined_call_operand.hbm [shape: f32[128,128], index: 3, kind: input, shape index: {}]   ;;  %s1764_s4 = inlined_call_operand.hbm [shape: f32[128,128], index: 4, kind: output, shape index: {0}]   ;;  %s1765_s5 = inlined_call_operand.hbm [shape: f32[128,128], index: 5, kind: output, shape index: {1}]  }
   0x1   :  { %12 = vsyncpa [#allocation6], 0 }
   0x2   :  { %13 = vsyncpa [#allocation4], 0 }
   0x3   :  { %14 = vsyncpa [#allocation10], 0  ;;  %s1413_s18 = smov [#allocation5]   ;;  %s1414_s20 = smov [#allocation2]  }
   0x4   :  { %s32_s19 = sshll.u32 %s1413_s18, 4  ;;  %s20_s21 = sshll.u32 %s1414_s20, 4  ;;  %s33_s19 = int_to_ptr.vmem [resolvable:$true] %s32_s19  ;;  %s1454_s21 = int_to_ptr.vmem [resolvable:$true] %s20_s21 }
   0x5   :  { %s1295_s24 = scalar_lea.hbm %s1761_s1, 2048 }
   0x6   :  { %p1296_p0 = scmp.ne.s32.totalorder %s1761_s1, %s1295_s24  ;;  %p1299_p1 = scmp.lt.u32.totalorder %s1295_s24, %s1761_s1 }
   0x8   :  { %p1301_p2 = pnand %p1299_p1, %p1296_p0 }
   0xa   :  { %1304 = shalt.err (!%p1301_p2)
}
   0xb   :  { %s1305_s29 = scalar_lea.vmem %s33_s19, 2048  ;;  %p1310_p4 = scmp.lt.s32.totalorder %s33_s19, %s33_s19 }
   0xc   :  { %p1306_p3 = scmp.ne.s32.totalorder %s33_s19, %s1305_s29  ;;  %p1311_p5 = scmp.lt.s32.totalorder %s1305_s29, %s1305_s29 }
   0xe   :  { %p1312_p6 = por %p1311_p5, %p1310_p4 }
  0x10   :  { %p1313_p7 = pnand %p1312_p6, %p1306_p3 }
  0x12   :  { %1316 = shalt.err (!%p1313_p7)
}
  0x13   :  { %s1415_s30 = smov 128   ;;  %s1416_s6 = smov 8  }
  0x14   :  { %38 = dma.hbm_to_vmem [thread:$0]  %s1761_s1, 2048, %s33_s19, [#allocation6], %s1415_s30, %s1415_s30, %s1416_s6  }
  0x15   :  { %s1317_s11 = scalar_lea.hbm %s1760_s0, 2048 }
  0x16   :  { %p1318_p8 = scmp.ne.s32.totalorder %s1760_s0, %s1317_s11  ;;  %p1321_p9 = scmp.lt.u32.totalorder %s1317_s11, %s1760_s0 }
  0x18   :  { %p1323_p10 = pnand %p1321_p9, %p1318_p8 }
  0x1a   :  { %1326 = shalt.err (!%p1323_p10)
}
  0x1b   :  { %s1327_s16 = scalar_lea.vmem %s1454_s21, 2048  ;;  %p1332_p12 = scmp.lt.s32.totalorder %s1454_s21, %s1454_s21 }
  0x1c   :  { %p1328_p11 = scmp.ne.s32.totalorder %s1454_s21, %s1327_s16  ;;  %p1333_p13 = scmp.lt.s32.totalorder %s1327_s16, %s1327_s16 }
  0x1e   :  { %p1334_p0 = por %p1333_p13, %p1332_p12 }
  0x20   :  { %p1335_p1 = pnand %p1334_p0, %p1328_p11 }
  0x22   :  { %1338 = shalt.err (!%p1335_p1)
}
  0x23   :  { %26 = dma.hbm_to_vmem [thread:$0]  %s1760_s0, 2048, %s1454_s21, [#allocation3], %s1415_s30, %s1415_s30, %s1416_s6  }
  0x24   :  { %s1417_s18 = smov [#allocation7]   ;;  %s1339_s23 = scalar_lea.hbm %s1763_s3, 2048 }
  0x25   :  { %s46_s19 = sshll.u32 %s1417_s18, 4  ;;  %p1340_p2 = scmp.ne.s32.totalorder %s1763_s3, %s1339_s23  ;;  %s47_s19 = int_to_ptr.vmem [resolvable:$true] %s46_s19 }
  0x26   :  { %p1343_p3 = scmp.lt.u32.totalorder %s1339_s23, %s1763_s3 }
  0x28   :  { %p1345_p4 = pnand %p1343_p3, %p1340_p2 }
  0x2a   :  { %1348 = shalt.err (!%p1345_p4)
}
  0x2b   :  { %s1349_s28 = scalar_lea.vmem %s47_s19, 2048  ;;  %p1354_p6 = scmp.lt.s32.totalorder %s47_s19, %s47_s19 }
  0x2c   :  { %p1350_p5 = scmp.ne.s32.totalorder %s47_s19, %s1349_s28  ;;  %p1355_p7 = scmp.lt.s32.totalorder %s1349_s28, %s1349_s28 }
  0x2e   :  { %p1356_p8 = por %p1355_p7, %p1354_p6 }
  0x30   :  { %p1357_p9 = pnand %p1356_p8, %p1350_p5 }
  0x32   :  { %1360 = shalt.err (!%p1357_p9)
}
  0x33   :  { %52 = dma.hbm_to_vmem [thread:$0]  %s1763_s3, 2048, %s47_s19, [#allocation6], %s1415_s30, %s1415_s30, %s1416_s6  }
  0x34   :  { %1405 = dma.done.wait [#allocation3], 2048  }
  0x35   :  { %1406 = vsyncadd [#allocation3], 4294965248 }
  0x36   :  { %1407 = dma.done.wait [#allocation6], 4096  }
  0x37   :  { %1408 = vsyncadd [#allocation6], 4294963200  ;;  %v82_v0 = vld [vmem:[#allocation5] sm:$0xff]  ;;  %v83_v1 = vld [vmem:[#allocation5 + $0x8] sm:$0xff]  ;;  %v1418_v56 = vmov 0.0|0.0   ;;  %vm1419_vm0 = vmmov 0  }
  0x38   :  { %v84_v2 = vld [vmem:[#allocation5 + $0x10] sm:$0xff]  ;;  %v1116_v3 = vpack.c.bf16 %v83_v1, %v82_v0  ;;  %v85_v4 = vld [vmem:[#allocation5 + $0x18] sm:$0xff]  ;;  %v66_v6 = vld [vmem:[#allocation2] sm:$0xff]  ;;  %v1420_v58 = vmov 0.0  }
  0x39   :  { %v1120_v5 = vpack.c.bf16 %v85_v4, %v84_v2  ;;  %v86_v7 = vld [vmem:[#allocation5 + $0x20] sm:$0xff]  ;;  %v87_v8 = vld [vmem:[#allocation5 + $0x28] sm:$0xff]  ;;  %1001 = vmatprep.mubr.f32.mxu1 %v66_v6  ;;  %v1506_v9 = vld [vmem:[#allocation2 + $0x10] sm:$0xff]  ;;  %v98_v10 = vmul.f32 %v66_v6, %v66_v6 }
  0x3a   :  { %1117 = vmatprep.subr.bf16.mxu1 %v1116_v3  ;;  %v1508_v11 = vld [vmem:[#allocation2 + $0x8] sm:$0xff]  ;;  %v100_v12 = vmul.f32 %v1506_v9, %v1506_v9  ;;  %v1512_v13 = vld [vmem:[#allocation2 + $0x18] sm:$0xff]  ;;  %v1124_v15 = vpack.c.bf16 %v87_v8, %v86_v7  ;;  %v1518_v17 = vld [vmem:[#allocation2 + $0x20] sm:$0xff] }
  0x3b   :  { %1119 = vmatpush3.bf16.xpose.msra.mxu1 %v1116_v3  ;;  %114 = vadd.xlane.f32.xlu0 %v98_v10  ;;  %v99_v14 = vmul.f32 %v1508_v11, %v1508_v11  ;;  %v101_v16 = vmul.f32 %v1512_v13, %v1512_v13  ;;  %v1520_v18 = vld [vmem:[#allocation2 + $0x28] sm:$0xff]  ;;  %v102_v19 = vmul.f32 %v1518_v17, %v1518_v17  ;;  %v88_v21 = vld [vmem:[#allocation5 + $0x30] sm:$0xff]  ;;  %v89_v22 = vld [vmem:[#allocation5 + $0x38] sm:$0xff] }
  0x3c   :  { %1121 = vmatprep.subr.bf16.mxu1 %v1120_v5  ;;  %118 = vadd.xlane.f32.xlu1 %v100_v12  ;;  %v103_v20 = vmul.f32 %v1520_v18, %v1520_v18  ;;  %v72_v23 = vld [vmem:[#allocation2 + $0x30] sm:$0xff]  ;;  %v73_v24 = vld [vmem:[#allocation2 + $0x38] sm:$0xff]  ;;  %v1128_v26 = vpack.c.bf16 %v89_v22, %v88_v21  ;;  %v74_v28 = vld [vmem:[#allocation2 + $0x40] sm:$0xff] }
  0x3d   :  { %v104_v25 = vmul.f32 %v72_v23, %v72_v23  ;;  %v105_v27 = vmul.f32 %v73_v24, %v73_v24  ;;  %v75_v29 = vld [vmem:[#allocation2 + $0x48] sm:$0xff]  ;;  %v106_v30 = vmul.f32 %v74_v28, %v74_v28  ;;  %v90_v32 = vld [vmem:[#allocation5 + $0x40] sm:$0xff]  ;;  %v76_v34 = vld [vmem:[#allocation2 + $0x50] sm:$0xff] }
  0x3e   :  { %v107_v31 = vmul.f32 %v75_v29, %v75_v29  ;;  %v91_v33 = vld [vmem:[#allocation5 + $0x48] sm:$0xff]  ;;  %v77_v35 = vld [vmem:[#allocation2 + $0x58] sm:$0xff]  ;;  %v108_v36 = vmul.f32 %v76_v34, %v76_v34  ;;  %v78_v39 = vld [vmem:[#allocation2 + $0x60] sm:$0xff] }
  0x3f   :  { %116 = vadd.xlane.f32.xlu0 %v99_v14  ;;  %v1132_v37 = vpack.c.bf16 %v91_v33, %v90_v32  ;;  %v109_v38 = vmul.f32 %v77_v35, %v77_v35  ;;  %v79_v40 = vld [vmem:[#allocation2 + $0x68] sm:$0xff]  ;;  %v110_v41 = vmul.f32 %v78_v39, %v78_v39  ;;  %v92_v43 = vld [vmem:[#allocation5 + $0x50] sm:$0xff]  ;;  %v93_v44 = vld [vmem:[#allocation5 + $0x58] sm:$0xff] }
  0x40   :  { %120 = vadd.xlane.f32.xlu1 %v101_v16  ;;  %v111_v42 = vmul.f32 %v79_v40, %v79_v40  ;;  %v80_v45 = vld [vmem:[#allocation2 + $0x70] sm:$0xff]  ;;  %v81_v46 = vld [vmem:[#allocation2 + $0x78] sm:$0xff]  ;;  %v1136_v48 = vpack.c.bf16 %v93_v44, %v92_v43  ;;  %v94_v50 = vld [vmem:[#allocation5 + $0x60] sm:$0xff] }
  0x41   :  { %v112_v47 = vmul.f32 %v80_v45, %v80_v45  ;;  %v113_v49 = vmul.f32 %v81_v46, %v81_v46  ;;  %v95_v51 = vld [vmem:[#allocation5 + $0x68] sm:$0xff]  ;;  %v96_v53 = vld [vmem:[#allocation5 + $0x70] sm:$0xff]  ;;  %v97_v54 = vld [vmem:[#allocation5 + $0x78] sm:$0xff] }
  0x42   :  { %v1140_v52 = vpack.c.bf16 %v95_v51, %v94_v50  ;;  %v1144_v55 = vpack.c.bf16 %v97_v54, %v96_v53  ;;  %v474_v57 = vld [vmem:[#allocation7] sm:$0xff]  ;;  %v1532_v61 = vld [vmem:[#allocation7 + $0x8] sm:$0xff]  ;;  %v1536_v0 = vld [vmem:[#allocation7 + $0x10] sm:$0xff] }
  0x43   :  { %1123 = vmatpush3.bf16.xpose.msra.mxu1 %v1120_v5  ;;  %122 = vadd.xlane.f32.xlu0 %v102_v19  ;;  %v491_v62 = vmul.f32 %v1532_v61, %v1532_v61  ;;  %v490_v63 = vmul.f32 %v474_v57, %v474_v57  ;;  %v1538_v1 = vld [vmem:[#allocation7 + $0x18] sm:$0xff]  ;;  %v492_v4 = vmul.f32 %v1536_v0, %v1536_v0  ;;  %v1544_v6 = vld [vmem:[#allocation7 + $0x20] sm:$0xff]  ;;  %v1546_v7 = vld [vmem:[#allocation7 + $0x28] sm:$0xff] }
  0x44   :  { %1125 = vmatprep.subr.bf16.mxu1 %v1124_v15  ;;  %124 = vadd.xlane.f32.xlu1 %v103_v20  ;;  %v493_v3 = vmul.f32 %v1538_v1, %v1538_v1  ;;  %v494_v10 = vmul.f32 %v1544_v6, %v1544_v6  ;;  %v1560_v16 = vld [vmem:[#allocation7 + $0x38] sm:$0xff]  ;;  %v1583_v51 = vld [vmem:[#allocation7 + $0x50] sm:$0xff] }
  0x45   :  { %1092 = vmatprep.mubr.f32.mxu0 %v474_v57  ;;  %v497_v20 = vmul.f32 %v1560_v16, %v1560_v16 }
  0x47   :  { %126 = vadd.xlane.f32.xlu0 %v104_v25 }
  0x48   :  { %128 = vadd.xlane.f32.xlu1 %v105_v27 }
  0x4b   :  { %1127 = vmatpush3.bf16.xpose.msra.mxu1 %v1124_v15  ;;  %130 = vadd.xlane.f32.xlu0 %v106_v30  ;;  %v1558_v15 = vld [vmem:[#allocation7 + $0x30] sm:$0xff]  ;;  %v1569_v30 = vld [vmem:[#allocation7 + $0x40] sm:$0xff] }
  0x4c   :  { %1129 = vmatprep.subr.bf16.mxu1 %v1128_v26  ;;  %132 = vadd.xlane.f32.xlu1 %v107_v31  ;;  %v496_v21 = vmul.f32 %v1558_v15, %v1558_v15  ;;  %v1571_v31 = vld [vmem:[#allocation7 + $0x48] sm:$0xff] }
  0x4f   :  { %134 = vadd.xlane.f32.xlu0 %v108_v36  ;;  %v499_v36 = vmul.f32 %v1571_v31, %v1571_v31 }
  0x50   :  { %136 = vadd.xlane.f32.xlu1 %v109_v38 }
  0x53   :  { %1131 = vmatpush3.bf16.xpose.msra.mxu1 %v1128_v26  ;;  %138 = vadd.xlane.f32.xlu0 %v110_v41 }
  0x54   :  { %1133 = vmatprep.subr.bf16.mxu1 %v1132_v37  ;;  %140 = vadd.xlane.f32.xlu1 %v111_v42 }
  0x57   :  { %142 = vadd.xlane.f32.xlu0 %v112_v47 }
  0x58   :  { %144 = vadd.xlane.f32.xlu1 %v113_v49 }
  0x5b   :  { %1135 = vmatpush3.bf16.xpose.msra.mxu1 %v1132_v37  ;;  %506 = vadd.xlane.f32.xlu0 %v490_v63  ;;  %v498_v37 = vmul.f32 %v1569_v30, %v1569_v30 }
  0x5c   :  { %1137 = vmatprep.subr.bf16.mxu1 %v1136_v48  ;;  %508 = vadd.xlane.f32.xlu1 %v491_v62 }
  0x5f   :  { %510 = vadd.xlane.f32.xlu0 %v492_v4 }
  0x60   :  { %512 = vadd.xlane.f32.xlu1 %v493_v3 }
  0x63   :  { %1139 = vmatpush3.bf16.xpose.msra.mxu1 %v1136_v48  ;;  %514 = vadd.xlane.f32.xlu0 %v494_v10 }
  0x64   :  { %1141 = vmatprep.subr.bf16.mxu1 %v1140_v52 }
  0x67   :  { %518 = vadd.xlane.f32.xlu0 %v496_v21 }
  0x6b   :  { %1143 = vmatpush3.bf16.xpose.msra.mxu1 %v1140_v52  ;;  %522 = vadd.xlane.f32.xlu0 %v498_v37 }
  0x6c   :  { %1145 = vmatprep.subr.bf16.mxu1 %v1144_v55 }
  0x73   :  { %1147 = vmatpush3.bf16.xpose.msra.mxu1 %v1144_v55 }
  0x74   :  { %1148 = vmatprep.subr.bf16.mxu1 %v1418_v56 }
  0x7a   :  { %1002 = vmatmul.mubr.f32.vlgmr.msra.gmra.mrb[0].mxu1 %v1508_v11  ;;  %v1555_v11 = vld [vmem:[%s1762_s2] ss:$0 sm:$0xff]  ;;  %s1422_s2 = smov [#allocation8]  }
  0x7b   :  { %1004 = vmatprep.mubr.f32.mxu1 %v1506_v9  ;;  %v495_v9 = vmul.f32 %v1546_v7, %v1546_v7  ;;  %s858_s7 = sshll.u32 %s1422_s2, 4  ;;  %s859_s7 = int_to_ptr.vmem [resolvable:$true] %s858_s7 }
  0x7c   :  { %s1361_s8 = scalar_lea.vmem %s859_s7, 2048  ;;  %p1366_p11 = scmp.lt.s32.totalorder %s859_s7, %s859_s7 }
  0x7d   :  { %516 = vadd.xlane.f32.xlu1 %v495_v9  ;;  %v1593_v9 = vld [vmem:[#allocation7 + $0x68] sm:$0xff]  ;;  %p1362_p10 = scmp.ne.s32.totalorder %s859_s7, %s1361_s8  ;;  %p1367_p12 = scmp.lt.s32.totalorder %s1361_s8, %s1361_s8 }
  0x7e   :  { %1005 = vmatmul.mubr.f32.gmra.mrb[2].mxu1 %v1512_v13 }
  0x7f   :  { %1007 = vmatprep.mubr.f32.mxu1 %v1518_v17  ;;  %p1368_p13 = por %p1367_p12, %p1366_p11 }
  0x81   :  { %520 = vadd.xlane.f32.xlu1 %v497_v20  ;;  %p1369_p0 = pnand %p1368_p13, %p1362_p10 }
  0x82   :  { %1008 = vmatmul.mubr.f32.gmra.mrb[4].mxu1 %v1520_v18 }
  0x83   :  { %1010 = vmatprep.mubr.f32.mxu1 %v72_v23 }
  0x85   :  { %524 = vadd.xlane.f32.xlu1 %v499_v36 }
  0x86   :  { %1011 = vmatmul.mubr.f32.gmra.mrb[6].mxu1 %v73_v24 }
  0x87   :  { %1013 = vmatprep.mubr.f32.mxu1 %v74_v28 }
  0x8a   :  { %1014 = vmatmul.mubr.f32.gmra.mrb[8].mxu1 %v75_v29 }
  0x8b   :  { %1016 = vmatprep.mubr.f32.mxu1 %v76_v34 }
  0x8e   :  { %1017 = vmatmul.mubr.f32.gmra.mrb[10].mxu1 %v77_v35 }
  0x8f   :  { %1019 = vmatprep.mubr.f32.mxu1 %v78_v39 }
  0x92   :  { %1020 = vmatmul.mubr.f32.gmra.mrb[12].mxu1 %v79_v40 }
  0x93   :  { %1022 = vmatprep.mubr.f32.mxu1 %v80_v45 }
  0x96   :  { %1023 = vmatmul.mubr.f32.gmra.mrb[14].mxu1 %v81_v46  ;;  %v1580_v46 = vld [vmem:[#allocation7 + $0x58] sm:$0xff] }
  0x97   :  { %1057 = vmatprep.mubr.msk.f32.mxu1 %vm1419_vm0, %v1420_v58  ;;  %v501_v52 = vmul.f32 %v1580_v46, %v1580_v46 }
  0x99   :  { %528 = vadd.xlane.f32.xlu1 %v501_v52 }
  0xc8   :  { %v115_v60 = vpop.xlane.xlu0 %114 }
  0xc9   :  { %v119_v59 = vpop.xlane.xlu1 %118  ;;  %v298_v22 = vadd.f32 %v1555_v11, %v115_v60 }
  0xca   :  { %v300_v27 = vadd.f32 %v1555_v11, %v119_v59  ;;  %v500_v59 = vmul.f32 %v1583_v51, %v1583_v51 }
  0xcc   :  { %v117_v5 = vpop.xlane.xlu0 %116  ;;  %526 = vadd.xlane.f32.xlu0 %v500_v59 }
  0xcd   :  { %v121_v2 = vpop.xlane.xlu1 %120  ;;  %v299_v13 = vadd.f32 %v1555_v11, %v117_v5 }
  0xce   :  { %v301_v26 = vadd.f32 %v1555_v11, %v121_v2 }
  0xd0   :  { %v123_v12 = vpop.xlane.xlu0 %122 }
  0xd1   :  { %v125_v8 = vpop.xlane.xlu1 %124  ;;  %v302_v44 = vadd.f32 %v1555_v11, %v123_v12 }
  0xd2   :  { %v303_v40 = vadd.f32 %v1555_v11, %v125_v8 }
  0xd4   :  { %v127_v24 = vpop.xlane.xlu0 %126 }
  0xd5   :  { %v129_v19 = vpop.xlane.xlu1 %128  ;;  %v304_v50 = vadd.f32 %v1555_v11, %v127_v24 }
  0xd6   :  { %v305_v45 = vadd.f32 %v1555_v11, %v129_v19 }
  0xd8   :  { %v131_v41 = vpop.xlane.xlu0 %130 }
  0xd9   :  { %v133_v35 = vpop.xlane.xlu1 %132  ;;  %v1591_v8 = vadd.f32 %v1555_v11, %v131_v41 }
  0xda   :  { %v307_v2 = vadd.f32 %v1555_v11, %v133_v35 }
  0xdc   :  { %v135_v3 = vpop.xlane.xlu0 %134 }
  0xdd   :  { %v137_v58 = vpop.xlane.xlu1 %136 }
 0x14d   :  { %v1003_v14 = vpop.f32.mrb[0].mxu1 }
 0x14e   :  { %v315_v17 = vmul.f32 2.0, %v1003_v14  ;;  %v212_v18 = vpop.f32.mrb[1].mxu1  ;;  %v1595_v14 = vld [vmem:[#allocation7 + $0x60] sm:$0xff] }
 0x14f   :  { %v314_v23 = vmul.f32 2.0, %v212_v18 }
 0x150   :  { %v331_v25 = vsub.f32 %v299_v13, %v315_v17  ;;  %v503_v17 = vmul.f32 %v1593_v9, %v1593_v9 }
 0x151   :  { %v330_v28 = vsub.f32 %v298_v22, %v314_v23  ;;  %v1006_v29 = vpop.f32.mrb[2].mxu1  ;;  %v141_v22 = vpop.xlane.xlu1 %140  ;;  %v502_v23 = vmul.f32 %v1595_v14, %v1595_v14 }
 0x152   :  { %v347_v32 = vmax.f32 %v331_v25, 0.0  ;;  %v317_v33 = vmul.f32 2.0, %v1006_v29  ;;  %v222_v34 = vpop.f32.mrb[3].mxu1  ;;  %532 = vadd.xlane.f32.xlu1 %v503_v17 }
 0x153   :  { %v346_v38 = vmax.f32 %v330_v28, 0.0  ;;  %v316_v39 = vmul.f32 2.0, %v222_v34  ;;  %v139_v28 = vpop.xlane.xlu0 %138  ;;  %v1607_v34 = vld [vmem:[#allocation7 + $0x78] sm:$0xff]  ;;  %530 = vadd.xlane.f32.xlu0 %v502_v23 }
 0x154   :  { %v363_v42 = vmul.f32 -0.0078125, %v347_v32  ;;  %v333_v43 = vsub.f32 %v301_v26, %v317_v33  ;;  %v1605_v33 = vadd.f32 %v1555_v11, %v135_v3 }
 0x155   :  { %v362_v47 = vmul.f32 -0.0078125, %v346_v38  ;;  %v332_v48 = vsub.f32 %v300_v27, %v316_v39  ;;  %v1009_v49 = vpop.f32.mrb[4].mxu1  ;;  %v1602_v27 = vadd.f32 %v1555_v11, %v137_v58  ;;  %v1609_v38 = vld [vmem:[#allocation7 + $0x70] sm:$0xff]  ;;  %v505_v39 = vmul.f32 %v1607_v34, %v1607_v34 }
 0x156   :  { %v380_v53 = vmul.f32 1.442695, %v363_v42  ;;  %v349_v54 = vmax.f32 %v333_v43, 0.0  ;;  %v319_v55 = vmul.f32 2.0, %v1009_v49  ;;  %v232_v57 = vpop.f32.mrb[5].mxu1 }
 0x157   :  { %v378_v60 = vmul.f32 1.442695, %v362_v47  ;;  %v348_v62 = vmax.f32 %v332_v48, 0.0  ;;  %v318_v63 = vmul.f32 2.0, %v232_v57  ;;  %v143_v52 = vpop.xlane.xlu0 %142  ;;  %536 = vadd.xlane.f32.xlu1 %v505_v39 }
 0x158   :  { %1215 = vpow2.f32 %v380_v53  ;;  %v365_v4 = vmul.f32 -0.0078125, %v349_v54  ;;  %v335_v5 = vsub.f32 %v303_v40, %v319_v55  ;;  %v1619_v55 = vadd.f32 %v1555_v11, %v139_v28 }
 0x159   :  { %1217 = vpow2.f32 %v378_v60  ;;  %v364_v10 = vmul.f32 -0.0078125, %v348_v62  ;;  %v334_v12 = vsub.f32 %v302_v44, %v318_v63  ;;  %v1012_v13 = vpop.f32.mrb[6].mxu1  ;;  %v145_v44 = vpop.xlane.xlu1 %144 }
 0x15a   :  { %v384_v18 = vmul.f32 1.442695, %v365_v4  ;;  %v351_v19 = vmax.f32 %v335_v5, 0.0  ;;  %v321_v20 = vmul.f32 2.0, %v1012_v13  ;;  %v242_v21 = vpop.f32.mrb[7].mxu1  ;;  %v1623_v60 = vadd.f32 %v1555_v11, %v145_v44 }
 0x15b   :  { %v382_v24 = vmul.f32 1.442695, %v364_v10  ;;  %v350_v25 = vmax.f32 %v334_v12, 0.0  ;;  %v320_v26 = vmul.f32 2.0, %v242_v21  ;;  %v1626_v10 = vadd.f32 %v1555_v11, %v143_v52 }
 0x15c   :  { %1219 = vpow2.f32 %v384_v18  ;;  %v367_v29 = vmul.f32 -0.0078125, %v351_v19  ;;  %v337_v32 = vsub.f32 %v305_v45, %v321_v20  ;;  %v504_v45 = vmul.f32 %v1609_v38, %v1609_v38 }
 0x15d   :  { %1221 = vpow2.f32 %v382_v24  ;;  %v366_v35 = vmul.f32 -0.0078125, %v350_v25  ;;  %v336_v36 = vsub.f32 %v304_v50, %v320_v26  ;;  %v1015_v37 = vpop.f32.mrb[8].mxu1  ;;  %v1616_v50 = vadd.f32 %v1555_v11, %v141_v22 }
 0x15e   :  { %v388_v40 = vmul.f32 1.442695, %v367_v29  ;;  %v353_v41 = vmax.f32 %v337_v32, 0.0  ;;  %v323_v42 = vmul.f32 2.0, %v1015_v37  ;;  %v252_v43 = vpop.f32.mrb[9].mxu1  ;;  %534 = vadd.xlane.f32.xlu0 %v504_v45 }
 0x15f   :  { %v386_v47 = vmul.f32 1.442695, %v366_v35  ;;  %v352_v48 = vmax.f32 %v336_v36, 0.0  ;;  %v322_v49 = vmul.f32 2.0, %v252_v43 }
 0x160   :  { %1223 = vpow2.f32 %v388_v40  ;;  %v369_v53 = vmul.f32 -0.0078125, %v353_v41  ;;  %v339_v54 = vsub.f32 %v307_v2, %v323_v42 }
 0x161   :  { %1225 = vpow2.f32 %v386_v47  ;;  %v368_v57 = vmul.f32 -0.0078125, %v352_v48  ;;  %v338_v58 = vsub.f32 %v1591_v8, %v322_v49  ;;  %v1018_v59 = vpop.f32.mrb[10].mxu1 }
 0x162   :  { %v1216_v62 = vpop.eup %1215  ;;  %v392_v63 = vmul.f32 1.442695, %v369_v53  ;;  %v355_v3 = vmax.f32 %v339_v54, 0.0  ;;  %v325_v4 = vmul.f32 2.0, %v1018_v59  ;;  %v262_v5 = vpop.f32.mrb[11].mxu1 }
 0x163   :  { %v1218_v2 = vpop.eup %1217  ;;  %vm411_vm1 = vcmp.ge.f32.partialorder %v1216_v62, 0.001  ;;  %v390_v12 = vmul.f32 1.442695, %v368_v57  ;;  %v354_v13 = vmax.f32 %v338_v58, 0.0  ;;  %v324_v17 = vmul.f32 2.0, %v262_v5 }
 0x164   :  { %v427_v8 = vsel %vm411_vm1, %v1216_v62, 0.0  ;;  %vm410_vm2 = vcmp.ge.f32.partialorder %v1218_v2, 0.001  ;;  %1227 = vpow2.f32 %v392_v63  ;;  %v371_v18 = vmul.f32 -0.0078125, %v355_v3 }
 0x165   :  { %443 = vst [vmem:[#allocation8 + $0x8] sm:$0xff] %v427_v8  ;;  %v426_v19 = vsel %vm410_vm2, %v1218_v2, 0.0  ;;  %1229 = vpow2.f32 %v390_v12  ;;  %v370_v20 = vmul.f32 -0.0078125, %v354_v13  ;;  %v539_v21 = vmul.f32 %v427_v8, %v427_v8  ;;  %v1021_v11 = vpop.f32.mrb[12].mxu1  ;;  %vm1247_vm5 = vmpackc.low %vm411_vm1, %vm410_vm2 }
 0x166   :  { %v1220_v22 = vpop.eup %1219  ;;  %442 = vst [vmem:[#allocation8] sm:$0xff] %v426_v19  ;;  %v396_v23 = vmul.f32 1.442695, %v371_v18  ;;  %v538_v24 = vmul.f32 %v426_v19, %v426_v19  ;;  %v341_v25 = vsub.f32 %v1602_v27, %v325_v4  ;;  %v272_v26 = vpop.f32.mrb[13].mxu1  ;;  %v340_v32 = vsub.f32 %v1605_v33, %v324_v17 }
 0x167   :  { %v1222_v28 = vpop.eup %1221  ;;  %vm413_vm3 = vcmp.ge.f32.partialorder %v1220_v22, 0.001  ;;  %v394_v29 = vmul.f32 1.442695, %v370_v20  ;;  %v327_v35 = vmul.f32 2.0, %v1021_v11  ;;  %v1248_v39 = vpack.c.bf16 %v1216_v62, %v1218_v2 }
 0x168   :  { %v429_v36 = vsel %vm413_vm3, %v1220_v22, 0.0  ;;  %vm412_vm4 = vcmp.ge.f32.partialorder %v1222_v28, 0.001  ;;  %1231 = vpow2.f32 %v396_v23  ;;  %v1149_v37 = vpack.c.bf16 %v539_v21, %v538_v24 }
 0x169   :  { %1249 = vmatprep.subr.msk.bf16.mxu0 %vm1247_vm5, %v1248_v39  ;;  %445 = vst [vmem:[#allocation8 + $0x18] sm:$0xff] %v429_v36  ;;  %v428_v27 = vsel %vm412_vm4, %v1222_v28, 0.0  ;;  %1233 = vpow2.f32 %v394_v29  ;;  %v357_v40 = vmax.f32 %v341_v25, 0.0  ;;  %v541_v41 = vmul.f32 %v429_v36, %v429_v36  ;;  %v1024_v42 = vpop.f32.mrb[14].mxu1  ;;  %vm1641_vm8 = vmpackc.low %vm413_vm3, %vm412_vm4 }
 0x16a   :  { %1252 = vmatpush3.bf16.xpose.msk.msra.mxu0 %vm1247_vm5, %v1248_v39  ;;  %v1224_v33 = vpop.eup %1223  ;;  %444 = vst [vmem:[#allocation8 + $0x10] sm:$0xff] %v428_v27  ;;  %1150 = vmatpush3.bf16.xpose.msra.mxu1 %v1149_v37  ;;  %v540_v43 = vmul.f32 %v428_v27, %v428_v27  ;;  %v356_v44 = vmax.f32 %v340_v32, 0.0  ;;  %v343_v45 = vsub.f32 %v1616_v50, %v327_v35  ;;  %v282_v47 = vpop.f32.mrb[15].mxu1  ;;  %v326_v52 = vmul.f32 2.0, %v272_v26 }
 0x16b   :  { %v1226_v48 = vpop.eup %1225  ;;  %vm415_vm6 = vcmp.ge.f32.partialorder %v1224_v33, 0.001  ;;  %v373_v49 = vmul.f32 -0.0078125, %v357_v40  ;;  %1151 = vmatprep.subr.bf16.mxu1 %v1418_v56  ;;  %v329_v53 = vmul.f32 2.0, %v1024_v42  ;;  %v1254_v58 = vpack.c.bf16 %v1220_v22, %v1222_v28 }
 0x16c   :  { %v431_v54 = vsel %vm415_vm6, %v1224_v33, 0.0  ;;  %vm414_vm7 = vcmp.ge.f32.partialorder %v1226_v48, 0.001  ;;  %v372_v50 = vmul.f32 -0.0078125, %v356_v44  ;;  %v1152_v59 = vpack.c.bf16 %v541_v41, %v540_v43 }
 0x16d   :  { %1255 = vmatprep.subr.msk.bf16.mxu0 %vm1641_vm8, %v1254_v58  ;;  %447 = vst [vmem:[#allocation8 + $0x28] sm:$0xff] %v431_v54  ;;  %v430_v62 = vsel %vm414_vm7, %v1226_v48, 0.0  ;;  %v400_v63 = vmul.f32 1.442695, %v373_v49  ;;  %v359_v3 = vmax.f32 %v343_v45, 0.0  ;;  %v342_v4 = vsub.f32 %v1619_v55, %v326_v52  ;;  %vm1656_vm11 = vmpackc.low %vm415_vm6, %vm414_vm7 }
 0x16e   :  { %v1228_v5 = vpop.eup %1227  ;;  %446 = vst [vmem:[#allocation8 + $0x20] sm:$0xff] %v430_v62  ;;  %v398_v2 = vmul.f32 1.442695, %v372_v50  ;;  %v542_v12 = vmul.f32 %v430_v62, %v430_v62  ;;  %v543_v13 = vmul.f32 %v431_v54, %v431_v54  ;;  %v345_v22 = vsub.f32 %v1623_v60, %v329_v53 }
 0x16f   :  { %v1230_v17 = vpop.eup %1229  ;;  %vm417_vm9 = vcmp.ge.f32.partialorder %v1228_v5, 0.001  ;;  %1235 = vpow2.f32 %v400_v63  ;;  %v375_v8 = vmul.f32 -0.0078125, %v359_v3  ;;  %v358_v18 = vmax.f32 %v342_v4, 0.0 }
 0x170   :  { %v433_v19 = vsel %vm417_vm9, %v1228_v5, 0.0  ;;  %vm416_vm10 = vcmp.ge.f32.partialorder %v1230_v17, 0.001  ;;  %1237 = vpow2.f32 %v398_v2  ;;  %v1155_v20 = vpack.c.bf16 %v543_v13, %v542_v12 }
 0x171   :  { %449 = vst [vmem:[#allocation8 + $0x38] sm:$0xff] %v433_v19  ;;  %v432_v21 = vsel %vm416_vm10, %v1230_v17, 0.0  ;;  %v404_v55 = vmul.f32 1.442695, %v375_v8  ;;  %v374_v11 = vmul.f32 -0.0078125, %v358_v18  ;;  %v1260_v25 = vpack.c.bf16 %v1224_v33, %v1226_v48  ;;  %vm1670_vm15 = vmpackc.low %vm417_vm9, %vm416_vm10 }
 0x172   :  { %1258 = vmatpush3.bf16.xpose.msk.msra.mxu0 %vm1641_vm8, %v1254_v58  ;;  %v1232_v23 = vpop.eup %1231  ;;  %448 = vst [vmem:[#allocation8 + $0x30] sm:$0xff] %v432_v21  ;;  %1153 = vmatpush3.bf16.xpose.msra.mxu1 %v1152_v59  ;;  %v328_v26 = vmul.f32 2.0, %v282_v47  ;;  %v544_v28 = vmul.f32 %v432_v21, %v432_v21  ;;  %v545_v29 = vmul.f32 %v433_v19, %v433_v19  ;;  %v361_v35 = vmax.f32 %v345_v22, 0.0 }
 0x173   :  { %1261 = vmatprep.subr.msk.bf16.mxu0 %vm1656_vm11, %v1260_v25  ;;  %v1234_v32 = vpop.eup %1233  ;;  %vm419_vm12 = vcmp.ge.f32.partialorder %v1232_v23, 0.001  ;;  %1239 = vpow2.f32 %v404_v55  ;;  %v402_v60 = vmul.f32 1.442695, %v374_v11  ;;  %1154 = vmatprep.subr.bf16.mxu1 %v1418_v56  ;;  %v1266_v52 = vpack.c.bf16 %v1228_v5, %v1230_v17 }
 0x174   :  { %v435_v36 = vsel %vm419_vm12, %v1232_v23, 0.0  ;;  %vm418_vm13 = vcmp.ge.f32.partialorder %v1234_v32, 0.001  ;;  %v344_v37 = vsub.f32 %v1626_v10, %v328_v26  ;;  %v1158_v39 = vpack.c.bf16 %v545_v29, %v544_v28 }
 0x175   :  { %451 = vst [vmem:[#allocation8 + $0x48] sm:$0xff] %v435_v36  ;;  %v434_v27 = vsel %vm418_vm13, %v1234_v32, 0.0  ;;  %1241 = vpow2.f32 %v402_v60  ;;  %v377_v40 = vmul.f32 -0.0078125, %v361_v35  ;;  %v547_v41 = vmul.f32 %v435_v36, %v435_v36  ;;  %vm1271_vm3 = vmpackc.low %vm419_vm12, %vm418_vm13 }
 0x176   :  { %450 = vst [vmem:[#allocation8 + $0x40] sm:$0xff] %v434_v27  ;;  %v360_v42 = vmax.f32 %v344_v37, 0.0  ;;  %v546_v33 = vmul.f32 %v434_v27, %v434_v27  ;;  %v1272_v5 = vpack.c.bf16 %v1232_v23, %v1234_v32  ;;  %v1421_v23 = vmov 1.0  }
 0x177   :  { %v408_v43 = vmul.f32 1.442695, %v377_v40 }
 0x178   :  { %v376_v44 = vmul.f32 -0.0078125, %v360_v42  ;;  %v1161_v45 = vpack.c.bf16 %v547_v41, %v546_v33 }
 0x179   :  { %v1236_v47 = vpop.eup %1235  ;;  %1243 = vpow2.f32 %v408_v43 }
 0x17a   :  { %1264 = vmatpush3.bf16.xpose.msk.msra.mxu0 %vm1656_vm11, %v1260_v25  ;;  %v1238_v48 = vpop.eup %1237  ;;  %vm421_vm14 = vcmp.ge.f32.partialorder %v1236_v47, 0.001  ;;  %1156 = vmatpush3.bf16.xpose.msra.mxu1 %v1155_v20  ;;  %v406_v10 = vmul.f32 1.442695, %v376_v44 }
 0x17b   :  { %1267 = vmatprep.subr.msk.bf16.mxu0 %vm1670_vm15, %v1266_v52  ;;  %v437_v53 = vsel %vm421_vm14, %v1236_v47, 0.0  ;;  %vm420_vm0 = vcmp.ge.f32.partialorder %v1238_v48, 0.001  ;;  %1157 = vmatprep.subr.bf16.mxu1 %v1418_v56  ;;  %v1278_v21 = vpack.c.bf16 %v1236_v47, %v1238_v48 }
 0x17c   :  { %453 = vst [vmem:[#allocation8 + $0x58] sm:$0xff] %v437_v53  ;;  %v436_v54 = vsel %vm420_vm0, %v1238_v48, 0.0  ;;  %1245 = vpow2.f32 %v406_v10  ;;  %v549_v57 = vmul.f32 %v437_v53, %v437_v53  ;;  %vm1277_vm6 = vmpackc.low %vm421_vm14, %vm420_vm0 }
 0x17d   :  { %v1240_v58 = vpop.eup %1239  ;;  %452 = vst [vmem:[#allocation8 + $0x50] sm:$0xff] %v436_v54  ;;  %v548_v50 = vmul.f32 %v436_v54, %v436_v54 }
 0x17e   :  { %vm423_vm1 = vcmp.ge.f32.partialorder %v1240_v58, 0.001 }
 0x17f   :  { %v1242_v59 = vpop.eup %1241  ;;  %v439_v62 = vsel %vm423_vm1, %v1240_v58, 0.0  ;;  %v1164_v63 = vpack.c.bf16 %v549_v57, %v548_v50 }
 0x180   :  { %455 = vst [vmem:[#allocation8 + $0x68] sm:$0xff] %v439_v62  ;;  %vm422_vm2 = vcmp.ge.f32.partialorder %v1242_v59, 0.001  ;;  %v551_v3 = vmul.f32 %v439_v62, %v439_v62  ;;  %v1284_v11 = vpack.c.bf16 %v1240_v58, %v1242_v59 }
 0x181   :  { %v438_v4 = vsel %vm422_vm2, %v1242_v59, 0.0  ;;  %vm1283_vm7 = vmpackc.low %vm423_vm1, %vm422_vm2 }
 0x182   :  { %1270 = vmatpush3.bf16.xpose.msk.msra.mxu0 %vm1670_vm15, %v1266_v52  ;;  %454 = vst [vmem:[#allocation8 + $0x60] sm:$0xff] %v438_v4  ;;  %1159 = vmatpush3.bf16.xpose.msra.mxu1 %v1158_v39  ;;  %v550_v2 = vmul.f32 %v438_v4, %v438_v4 }
 0x183   :  { %1273 = vmatprep.subr.msk.bf16.mxu0 %vm1271_vm3, %v1272_v5  ;;  %v1244_v12 = vpop.eup %1243  ;;  %1160 = vmatprep.subr.bf16.mxu1 %v1418_v56 }
 0x184   :  { %vm425_vm4 = vcmp.ge.f32.partialorder %v1244_v12, 0.001  ;;  %v1167_v13 = vpack.c.bf16 %v551_v3, %v550_v2 }
 0x185   :  { %v441_v17 = vsel %vm425_vm4, %v1244_v12, 0.0 }
 0x186   :  { %v1246_v8 = vpop.eup %1245  ;;  %457 = vst [vmem:[#allocation8 + $0x78] sm:$0xff] %v441_v17  ;;  %v553_v18 = vmul.f32 %v441_v17, %v441_v17 }
 0x187   :  { %vm424_vm5 = vcmp.ge.f32.partialorder %v1246_v8, 0.001  ;;  %v1290_v22 = vpack.c.bf16 %v1244_v12, %v1246_v8 }
 0x188   :  { %v440_v19 = vsel %vm424_vm5, %v1246_v8, 0.0  ;;  %vm1289_vm8 = vmpackc.low %vm425_vm4, %vm424_vm5 }
 0x189   :  { %456 = vst [vmem:[#allocation8 + $0x70] sm:$0xff] %v440_v19  ;;  %v552_v20 = vmul.f32 %v440_v19, %v440_v19 }
 0x18a   :  { %1276 = vmatpush3.bf16.xpose.msk.msra.mxu0 %vm1271_vm3, %v1272_v5  ;;  %1162 = vmatpush3.bf16.xpose.msra.mxu1 %v1161_v45 }
 0x18b   :  { %1279 = vmatprep.subr.msk.bf16.mxu0 %vm1277_vm6, %v1278_v21  ;;  %1163 = vmatprep.subr.bf16.mxu1 %v1418_v56  ;;  %v1170_v55 = vpack.c.bf16 %v553_v18, %v552_v20 }
 0x192   :  { %1282 = vmatpush3.bf16.xpose.msk.msra.mxu0 %vm1277_vm6, %v1278_v21  ;;  %1165 = vmatpush3.bf16.xpose.msra.mxu1 %v1164_v63 }
 0x193   :  { %1285 = vmatprep.subr.msk.bf16.mxu0 %vm1283_vm7, %v1284_v11  ;;  %1166 = vmatprep.subr.bf16.mxu1 %v1418_v56 }
 0x19a   :  { %1288 = vmatpush3.bf16.xpose.msk.msra.mxu0 %vm1283_vm7, %v1284_v11  ;;  %1168 = vmatpush3.bf16.xpose.msra.mxu1 %v1167_v13 }
 0x19b   :  { %1291 = vmatprep.subr.msk.bf16.mxu0 %vm1289_vm8, %v1290_v22  ;;  %1169 = vmatprep.subr.bf16.mxu1 %v1418_v56 }
 0x1a2   :  { %1294 = vmatpush3.bf16.xpose.msk.msra.mxu0 %vm1289_vm8, %v1290_v22  ;;  %1171 = vmatpush3.bf16.xpose.msra.mxu1 %v1170_v55 }
 0x1a9   :  { %1093 = vmatmul.mubr.f32.vlgmr.msra.gmra.mrb[0].mxu0 %v1532_v61  ;;  %1058 = vmatmul.mubr.f32.vlgmr.msra.gmra.mrb[16].mxu1 %v1421_v23 }
 0x1aa   :  { %1095 = vmatprep.mubr.f32.mxu0 %v1536_v0 }
 0x1ad   :  { %1096 = vmatmul.mubr.f32.gmra.mrb[2].mxu0 %v1538_v1 }
 0x1ae   :  { %1098 = vmatprep.mubr.f32.mxu0 %v1544_v6 }
 0x1b1   :  { %1099 = vmatmul.mubr.f32.gmra.mrb[4].mxu0 %v1546_v7 }
 0x1b2   :  { %1101 = vmatprep.mubr.f32.mxu0 %v1558_v15 }
 0x1b5   :  { %1102 = vmatmul.mubr.f32.gmra.mrb[6].mxu0 %v1560_v16 }
 0x1b6   :  { %1104 = vmatprep.mubr.f32.mxu0 %v1569_v30 }
 0x1b9   :  { %1105 = vmatmul.mubr.f32.gmra.mrb[8].mxu0 %v1571_v31 }
 0x1ba   :  { %1107 = vmatprep.mubr.f32.mxu0 %v1583_v51 }
 0x1bd   :  { %1108 = vmatmul.mubr.f32.gmra.mrb[10].mxu0 %v1580_v46 }
 0x1be   :  { %1110 = vmatprep.mubr.f32.mxu0 %v1595_v14 }
 0x1c1   :  { %1111 = vmatmul.mubr.f32.gmra.mrb[12].mxu0 %v1593_v9 }
 0x1c2   :  { %1113 = vmatprep.mubr.f32.mxu0 %v1609_v38 }
 0x1c5   :  { %1114 = vmatmul.mubr.f32.gmra.mrb[14].mxu0 %v1607_v34 }
 0x1c6   :  { %1372 = shalt.err (!%p1369_p0)
}
 0x1c7   :  { %s1373_s11 = scalar_lea.hbm %s1764_s4, 2048 }
 0x1c8   :  { %p1374_p1 = scmp.ne.s32.totalorder %s1764_s4, %s1373_s11  ;;  %p1377_p2 = scmp.lt.u32.totalorder %s1373_s11, %s1764_s4 }
 0x1ca   :  { %p1379_p3 = pnand %p1377_p2, %p1374_p1 }
 0x1cc   :  { %1382 = shalt.err (!%p1379_p3)
}
 0x1cd   :  { %864 = dma.vmem_to_hbm [thread:$0]  %s859_s7, 2048, %s1764_s4, [#allocation4], %s1415_s30, %s1415_s30, %s1416_s6   ;;  %v509_v56 = vpop.xlane.xlu1 %508  ;;  %v507_v61 = vpop.xlane.xlu0 %506  ;;  %v769_v6 = vlaneseq }
 0x1ce   :  { %s1423_s4 = smov [#allocation9]  }
 0x1cf   :  { %v770_v15 = vshrl.u32 %v769_v6, 7  ;;  %s870_s17 = sshll.u32 %s1423_s4, 4  ;;  %s871_s17 = int_to_ptr.vmem [resolvable:$true] %s870_s17 }
 0x1d0   :  { %s1383_s18 = scalar_lea.vmem %s871_s17, 2048  ;;  %p1388_p5 = scmp.lt.s32.totalorder %s871_s17, %s871_s17 }
 0x1d1   :  { %v513_v0 = vpop.xlane.xlu1 %512  ;;  %v511_v1 = vpop.xlane.xlu0 %510  ;;  %v771_v30 = vsub.s32 0, %v770_v15  ;;  %p1384_p4 = scmp.ne.s32.totalorder %s871_s17, %s1383_s18  ;;  %p1389_p6 = scmp.lt.s32.totalorder %s1383_s18, %s1383_s18 }
 0x1d3   :  { %p1390_p7 = por %p1389_p6, %p1388_p5 }
 0x1d5   :  { %v517_v7 = vpop.xlane.xlu1 %516  ;;  %v515_v16 = vpop.xlane.xlu0 %514  ;;  %p1391_p8 = pnand %p1390_p7, %p1384_p4 }
 0x1d9   :  { %v521_v31 = vpop.xlane.xlu1 %520  ;;  %v519_v51 = vpop.xlane.xlu0 %518 }
 0x1dd   :  { %v525_v37 = vpop.xlane.xlu1 %524  ;;  %v523_v40 = vpop.xlane.xlu0 %522 }
 0x1e1   :  { %v529_v62 = vpop.xlane.xlu1 %528  ;;  %v527_v5 = vpop.xlane.xlu0 %526 }
 0x27c   :  { %v1094_v46 = vpop.f32.mrb[0].mxu0  ;;  %v620_v9 = vpop.f32.mrb[16].mxu1 }
 0x27d   :  { %v690_v14 = vpop.f32.mrb[1].mxu0  ;;  %v1727_v34 = vrot.slane %v620_v9, %v771_v30  ;;  %v1059_v38 = vpop.f32.mrb[17].mxu1  ;;  %v790_v44 = vmul.f32 2.0, %v1094_v46 }
 0x27e   :  { %v789_v24 = vmul.f32 2.0, %v690_v14 }
 0x27f   :  { %v773_v25 = vadd.f32 %v1727_v34, %v507_v61  ;;  %v776_v26 = vadd.f32 %v1727_v34, %v513_v0  ;;  %v775_v29 = vadd.f32 %v1727_v34, %v511_v1  ;;  %v778_v27 = vadd.f32 %v1727_v34, %v517_v7  ;;  %v531_v1 = vpop.xlane.xlu0 %530 }
 0x280   :  { %v1097_v28 = vpop.f32.mrb[2].mxu0  ;;  %v777_v43 = vadd.f32 %v1727_v34, %v515_v16  ;;  %v774_v10 = vadd.f32 %v1727_v34, %v509_v56  ;;  %v780_v54 = vadd.f32 %v1727_v34, %v521_v31  ;;  %v779_v59 = vadd.f32 %v1727_v34, %v519_v51  ;;  %v533_v56 = vpop.xlane.xlu1 %532 }
 0x281   :  { %v792_v32 = vmul.f32 2.0, %v1097_v28  ;;  %v700_v60 = vpop.f32.mrb[3].mxu0  ;;  %v805_v35 = vsub.f32 %v773_v25, %v789_v24  ;;  %v782_v8 = vadd.f32 %v1727_v34, %v525_v37  ;;  %v781_v20 = vadd.f32 %v1727_v34, %v523_v40 }
 0x282   :  { %v791_v36 = vmul.f32 2.0, %v700_v60  ;;  %v806_v57 = vsub.f32 %v774_v10, %v790_v44  ;;  %v784_v0 = vadd.f32 %v1727_v34, %v529_v62  ;;  %v783_v15 = vadd.f32 %v1727_v34, %v527_v5 }
 0x283   :  { %v808_v39 = vsub.f32 %v776_v26, %v792_v32  ;;  %v821_v41 = vmul.f32 0.0078125, %v805_v35  ;;  %v786_v14 = vadd.f32 %v1727_v34, %v533_v56  ;;  %v785_v25 = vadd.f32 %v1727_v34, %v531_v1  ;;  %v535_v60 = vpop.xlane.xlu0 %534 }
 0x284   :  { %v807_v42 = vsub.f32 %v775_v29, %v791_v36  ;;  %v1100_v33 = vpop.f32.mrb[4].mxu0  ;;  %v822_v2 = vmul.f32 0.0078125, %v806_v57  ;;  %v537_v26 = vpop.xlane.xlu1 %536 }
 0x285   :  { %v824_v45 = vmul.f32 0.0078125, %v808_v39  ;;  %v794_v47 = vmul.f32 2.0, %v1100_v33  ;;  %v710_v48 = vpop.f32.mrb[5].mxu0  ;;  %837 = vst [vmem:[#allocation9] sm:$0xff] %v821_v41  ;;  %v788_v39 = vadd.f32 %v1727_v34, %v537_v26  ;;  %v787_v41 = vadd.f32 %v1727_v34, %v535_v60 }
 0x286   :  { %v823_v49 = vmul.f32 0.0078125, %v807_v42  ;;  %v793_v52 = vmul.f32 2.0, %v710_v48  ;;  %838 = vst [vmem:[#allocation9 + $0x8] sm:$0xff] %v822_v2 }
 0x287   :  { %840 = vst [vmem:[#allocation9 + $0x18] sm:$0xff] %v824_v45  ;;  %v810_v53 = vsub.f32 %v778_v27, %v794_v47 }
 0x288   :  { %839 = vst [vmem:[#allocation9 + $0x10] sm:$0xff] %v823_v49  ;;  %v809_v58 = vsub.f32 %v777_v43, %v793_v52  ;;  %v1103_v50 = vpop.f32.mrb[6].mxu0 }
 0x289   :  { %v826_v63 = vmul.f32 0.0078125, %v810_v53  ;;  %v796_v3 = vmul.f32 2.0, %v1103_v50  ;;  %v720_v4 = vpop.f32.mrb[7].mxu0 }
 0x28a   :  { %v825_v12 = vmul.f32 0.0078125, %v809_v58  ;;  %v795_v13 = vmul.f32 2.0, %v720_v4 }
 0x28b   :  { %842 = vst [vmem:[#allocation9 + $0x28] sm:$0xff] %v826_v63  ;;  %v812_v17 = vsub.f32 %v780_v54, %v796_v3 }
 0x28c   :  { %841 = vst [vmem:[#allocation9 + $0x20] sm:$0xff] %v825_v12  ;;  %v811_v18 = vsub.f32 %v779_v59, %v795_v13  ;;  %v1106_v19 = vpop.f32.mrb[8].mxu0 }
 0x28d   :  { %v828_v21 = vmul.f32 0.0078125, %v812_v17  ;;  %v798_v55 = vmul.f32 2.0, %v1106_v19  ;;  %v730_v11 = vpop.f32.mrb[9].mxu0 }
 0x28e   :  { %v827_v22 = vmul.f32 0.0078125, %v811_v18  ;;  %v797_v23 = vmul.f32 2.0, %v730_v11 }
 0x28f   :  { %844 = vst [vmem:[#allocation9 + $0x38] sm:$0xff] %v828_v21  ;;  %v814_v61 = vsub.f32 %v782_v8, %v798_v55 }
 0x290   :  { %843 = vst [vmem:[#allocation9 + $0x30] sm:$0xff] %v827_v22  ;;  %v813_v6 = vsub.f32 %v781_v20, %v797_v23  ;;  %v1109_v7 = vpop.f32.mrb[10].mxu0 }
 0x291   :  { %v830_v16 = vmul.f32 0.0078125, %v814_v61  ;;  %v800_v30 = vmul.f32 2.0, %v1109_v7  ;;  %v740_v31 = vpop.f32.mrb[11].mxu0 }
 0x292   :  { %v829_v46 = vmul.f32 0.0078125, %v813_v6  ;;  %v799_v51 = vmul.f32 2.0, %v740_v31 }
 0x293   :  { %846 = vst [vmem:[#allocation9 + $0x48] sm:$0xff] %v830_v16  ;;  %v816_v9 = vsub.f32 %v784_v0, %v800_v30 }
 0x294   :  { %845 = vst [vmem:[#allocation9 + $0x40] sm:$0xff] %v829_v46  ;;  %v815_v38 = vsub.f32 %v783_v15, %v799_v51  ;;  %v1112_v24 = vpop.f32.mrb[12].mxu0 }
 0x295   :  { %v832_v28 = vmul.f32 0.0078125, %v816_v9  ;;  %v802_v29 = vmul.f32 2.0, %v1112_v24  ;;  %v750_v32 = vpop.f32.mrb[13].mxu0 }
 0x296   :  { %v831_v35 = vmul.f32 0.0078125, %v815_v38  ;;  %v801_v36 = vmul.f32 2.0, %v750_v32 }
 0x297   :  { %848 = vst [vmem:[#allocation9 + $0x58] sm:$0xff] %v832_v28  ;;  %v818_v37 = vsub.f32 %v786_v14, %v802_v29 }
 0x298   :  { %847 = vst [vmem:[#allocation9 + $0x50] sm:$0xff] %v831_v35  ;;  %v817_v27 = vsub.f32 %v785_v25, %v801_v36  ;;  %v1115_v40 = vpop.f32.mrb[14].mxu0 }
 0x299   :  { %v834_v42 = vmul.f32 0.0078125, %v818_v37  ;;  %v804_v33 = vmul.f32 2.0, %v1115_v40  ;;  %v760_v43 = vpop.f32.mrb[15].mxu0 }
 0x29a   :  { %v833_v44 = vmul.f32 0.0078125, %v817_v27  ;;  %v803_v45 = vmul.f32 2.0, %v760_v43 }
 0x29b   :  { %850 = vst [vmem:[#allocation9 + $0x68] sm:$0xff] %v834_v42  ;;  %v820_v47 = vsub.f32 %v788_v39, %v804_v33 }
 0x29c   :  { %849 = vst [vmem:[#allocation9 + $0x60] sm:$0xff] %v833_v44  ;;  %v819_v48 = vsub.f32 %v787_v41, %v803_v45 }
 0x29d   :  { %v836_v10 = vmul.f32 0.0078125, %v820_v47 }
 0x29e   :  { %v835_v49 = vmul.f32 0.0078125, %v819_v48 }
 0x29f   :  { %852 = vst [vmem:[#allocation9 + $0x78] sm:$0xff] %v836_v10 }
 0x2a0   :  { %851 = vst [vmem:[#allocation9 + $0x70] sm:$0xff] %v835_v49 }
 0x2a1   :  { %1394 = shalt.err (!%p1391_p8)
}
 0x2a2   :  { %s1395_s22 = scalar_lea.hbm %s1765_s5, 2048 }
 0x2a3   :  { %p1396_p9 = scmp.ne.s32.totalorder %s1765_s5, %s1395_s22  ;;  %p1399_p10 = scmp.lt.u32.totalorder %s1395_s22, %s1765_s5 }
 0x2a5   :  { %p1401_p11 = pnand %p1399_p10, %p1396_p9 }
 0x2a7   :  { %1404 = shalt.err (!%p1401_p11)
}
 0x2a8   :  { %876 = dma.vmem_to_hbm [thread:$0]  %s871_s17, 2048, %s1765_s5, [#allocation10], %s1415_s30, %s1415_s30, %s1416_s6  }
 0x2a9   :  { %1409 = dma.done.wait [#allocation4], 2048  }
 0x2aa   :  { %1410 = vsyncadd [#allocation4], 4294965248 }
 0x2ab   :  { %1411 = dma.done.wait [#allocation10], 2048  }
 0x2ac   :  { %1412 = vsyncadd [#allocation10], 4294965248 }
 0x2ad   :  { %883 = vsyncpa [#allocation3], 1 }
 0x2ae   :  { %884 = vsyncpa [#allocation6], 1 }
 0x2af   :  { %885 = vsyncpa [#allocation4], 1 }
 0x2b0   :  { %886 = vsyncpa [#allocation10], 1 }

</bundles_post_ra>
